<compile_context>
chip_gen: v5e
topology: v5e:2x2
jax: 0.10.0
libtpu: 0.0.40
codegen_flags: <defaults>
</compile_context>

<pallas_src>
import functools

import jax
import jax.numpy as jnp
from jax.experimental import pallas as pl
from jax.experimental.pallas import tpu as pltpu

BN_EPS = 1e-5
_LANE = 128
_SUBLANE = 8


def _round_up(x, m):
    return (x + m - 1) // m * m


def _decoder_kernel(*refs, keep_threshold, apply_dropout):
    if apply_dropout:
        s_ref, t_ref, w2t_ref, b2_ref, x_ref, bits_ref, out_ref = refs
    else:
        s_ref, t_ref, w2t_ref, b2_ref, x_ref, out_ref = refs
        bits_ref = None

    # Folded BatchNorm (+ dropout 1/(1-p) scale pre-folded into s/t):
    #   y = x * s + t       -> one FMA-equivalent per element on the VPU.
    y = x_ref[...] * s_ref[...] + t_ref[...]

    if apply_dropout:
        # Integer-domain keep test: P(bits >= thr) == 1 - p. The 1/(1-p)
        # rescale is already folded into s/t, so dropped lanes just go to 0.
        keep = bits_ref[...] >= jnp.uint32(keep_threshold)
        y = jnp.where(keep, y, 0.0)

    # fc2 on the MXU: bf16 operands, f32 accumulation.
    z = jnp.dot(y.astype(jnp.bfloat16), w2t_ref[...],
                preferred_element_type=jnp.float32)
    z = z + b2_ref[...]
    out_ref[...] = jnp.maximum(z, 0.0).astype(out_ref.dtype)


def decoder_forward(x, gamma, beta, w2t, b2, key, *, dropout_rate,
                    training=True, tile_b=512):
    """x: [B, latent_dim] f32. w2t: [latent_dim, feature_dim] (fc2 weight^T).
    Returns [B, feature_dim] f32."""
    B, L = x.shape
    Lw, F = w2t.shape
    assert Lw == L
    apply_dropout = bool(training) and float(dropout_rate) > 0.0

    # ---- BatchNorm1d training-mode stats over the FULL batch (wrapper/XLA),
    #      folded to per-feature scale/shift. ----
    x32 = x.astype(jnp.float32)
    mean = jnp.mean(x32, axis=0, keepdims=True)                  # [1, L]
    var = jnp.mean((x32 - mean) ** 2, axis=0, keepdims=True)     # biased var
    inv = jax.lax.rsqrt(var + BN_EPS)
    s = gamma.reshape(1, L).astype(jnp.float32) * inv            # [1, L]
    t = beta.reshape(1, L).astype(jnp.float32) - mean * s        # [1, L]
    keep_threshold = 0
    if apply_dropout:
        p = float(dropout_rate)
        inv_keep = 1.0 / (1.0 - p)
        s = s * inv_keep
        t = t * inv_keep
        keep_threshold = min(int(round(p * (2 ** 32))), 2 ** 32 - 1)

    # ---- Lane-dense output padding: F -> multiple of 128, zero-padded. ----
    F_pad = _round_up(F, _LANE)
    w2t_p = jnp.zeros((L, F_pad), jnp.bfloat16).at[:, :F].set(
        w2t.astype(jnp.bfloat16))
    b2_p = jnp.zeros((1, F_pad), jnp.float32).at[:, :F].set(
        b2.reshape(1, F).astype(jnp.float32))

    # ---- Batch tiling (sublane aligned). ----
    tb = max(_SUBLANE, _round_up(min(int(tile_b), B), _SUBLANE))
    B_pad = _round_up(B, tb)
    x_p = jnp.zeros((B_pad, L), jnp.float32).at[:B].set(x32)

    const_map = lambda i: (0, 0)
    row_map = lambda i: (i, 0)
    in_specs = [
        pl.BlockSpec((1, L), const_map),        # s (folded scale)
        pl.BlockSpec((1, L), const_map),        # t (folded shift)
        pl.BlockSpec((L, F_pad), const_map),    # w2t (bf16, padded)
        pl.BlockSpec((1, F_pad), const_map),    # b2  (padded)
        pl.BlockSpec((tb, L), row_map),         # x tile
    ]
    args = [s, t, w2t_p, b2_p, x_p]
    if apply_dropout:
        bits = jax.random.bits(key, (B_pad, L), jnp.uint32)
        in_specs.append(pl.BlockSpec((tb, L), row_map))
        args.append(bits)

    kernel = functools.partial(_decoder_kernel,
                               keep_threshold=keep_threshold,
                               apply_dropout=apply_dropout)

    out_p = pl.pallas_call(
        kernel,
        out_shape=jax.ShapeDtypeStruct((B_pad, F_pad), jnp.float32),
        grid=(B_pad // tb,),
        in_specs=in_specs,
        out_specs=pl.BlockSpec((tb, F_pad), row_map),
        compiler_params=pltpu.CompilerParams(
            dimension_semantics=("parallel",)),
    )(*args)

    return out_p[:B, :F]


def reference_forward(x, gamma, beta, w2t, b2):
    """Pure-JAX f32 reference (dropout disabled) for correctness checking."""
    mean = jnp.mean(x, axis=0, keepdims=True)
    var = jnp.mean((x - mean) ** 2, axis=0, keepdims=True)
    y = (x - mean) / jnp.sqrt(var + BN_EPS) * gamma.reshape(1, -1) \
        + beta.reshape(1, -1)
    z = y @ w2t + b2.reshape(1, -1)
    return jnp.maximum(z, 0.0)


def init_params(key, feature_dim, latent_dim):
    """Init matching the torch module's shapes.
    fc2.weight: xavier_normal_, shape [feature_dim, latent_dim] (stored
    transposed as [latent_dim, feature_dim]); fc2.bias: U(+-1/sqrt(latent_dim));
    bn1: gamma=1, beta=0."""
    k_w, k_b = jax.random.split(key)
    std = (2.0 / (feature_dim + latent_dim)) ** 0.5
    w2 = std * jax.random.normal(k_w, (feature_dim, latent_dim), jnp.float32)
    bound = 1.0 / (latent_dim ** 0.5)
    b2 = jax.random.uniform(k_b, (1, feature_dim), jnp.float32, -bound, bound)
    gamma = jnp.ones((1, latent_dim), jnp.float32)
    beta = jnp.zeros((1, latent_dim), jnp.float32)
    return gamma, beta, w2.T, b2   # w2 stored transposed: [latent_dim, feature_dim]


if __name__ == "__main__":
    B, LATENT, FEATURE = 8, 32, 64
    DROPOUT_RATE = 0.2

    key = jax.random.PRNGKey(0)
    k_x, k_p, k_d = jax.random.split(key, 3)
    x = jax.random.normal(k_x, (B, LATENT), jnp.float32)
    gamma, beta, w2t, b2 = init_params(k_p, FEATURE, LATENT)

    # Correctness check with dropout disabled (p=0 -> identity).
    out_nodrop = decoder_forward(x, gamma, beta, w2t, b2, k_d,
                                 dropout_rate=0.0, training=True)
    out_nodrop = jax.block_until_ready(out_nodrop)
    ref = reference_forward(x, gamma, beta, w2t, b2)
    assert out_nodrop.shape == (B, FEATURE)
    # bf16 MXU operands -> loosened tolerance vs the f32 reference.
    assert jnp.allclose(out_nodrop, ref, atol=2e-2, rtol=2e-2), \
        "mismatch vs reference"

    # Full training-mode forward with dropout active.
    out = decoder_forward(x, gamma, beta, w2t, b2, k_d,
                          dropout_rate=DROPOUT_RATE, training=True)
    out = jax.block_until_ready(out)
    assert out.shape == (B, FEATURE)
    assert bool(jnp.all(out >= 0.0))   # ReLU post-condition

    print("KERNEL_OK")
</pallas_src>

<mosaic_0001>
module attributes {stable_mosaic.version = 11 : i64} {
  func.func @_decoder_kernel(%arg0: i32, %arg1: memref<1x32xf32, #tpu.memory_space<vmem>>, %arg2: memref<1x32xf32, #tpu.memory_space<vmem>>, %arg3: memref<32x128xbf16, #tpu.memory_space<vmem>>, %arg4: memref<1x128xf32, #tpu.memory_space<vmem>>, %arg5: memref<8x32xf32, #tpu.memory_space<vmem>>, %arg6: memref<8x128xf32, #tpu.memory_space<vmem>>) attributes {dimension_semantics = [#tpu.dimension_semantics<parallel>], iteration_bounds = array<i64: 1>, scalar_prefetch = 0 : i64, scratch_operands = 0 : i64, tpu.core_type = #tpu.core_type<tc>, window_params = [{pipeline_mode = #tpu.pipeline_mode<synchronous>, transform_indices = @transform_0, window_bounds = array<i64: 1, 32>}, {pipeline_mode = #tpu.pipeline_mode<synchronous>, transform_indices = @transform_1, window_bounds = array<i64: 1, 32>}, {pipeline_mode = #tpu.pipeline_mode<synchronous>, transform_indices = @transform_2, window_bounds = array<i64: 32, 128>}, {pipeline_mode = #tpu.pipeline_mode<synchronous>, transform_indices = @transform_3, window_bounds = array<i64: 1, 128>}, {transform_indices = @transform_4, window_bounds = array<i64: 8, 32>}, {transform_indices = @transform_5, window_bounds = array<i64: 8, 128>}]} {
    %c0 = arith.constant 0 : index
    %c0_0 = arith.constant 0 : index
    %0 = vector.load %arg5[%c0, %c0_0] : memref<8x32xf32, #tpu.memory_space<vmem>>, vector<8x32xf32>
    %c0_1 = arith.constant 0 : index
    %c0_2 = arith.constant 0 : index
    %1 = vector.load %arg1[%c0_1, %c0_2] : memref<1x32xf32, #tpu.memory_space<vmem>>, vector<1x32xf32>
    %2 = vector.broadcast %1 : vector<1x32xf32> to vector<8x32xf32>
    %3 = arith.mulf %0, %2 : vector<8x32xf32>
    %c0_3 = arith.constant 0 : index
    %c0_4 = arith.constant 0 : index
    %4 = vector.load %arg2[%c0_3, %c0_4] : memref<1x32xf32, #tpu.memory_space<vmem>>, vector<1x32xf32>
    %5 = vector.broadcast %4 : vector<1x32xf32> to vector<8x32xf32>
    %6 = arith.addf %3, %5 : vector<8x32xf32>
    %7 = arith.truncf %6 : vector<8x32xf32> to vector<8x32xbf16>
    %c0_5 = arith.constant 0 : index
    %c0_6 = arith.constant 0 : index
    %8 = vector.load %arg3[%c0_5, %c0_6] : memref<32x128xbf16, #tpu.memory_space<vmem>>, vector<32x128xbf16>
    %cst = arith.constant dense<0.000000e+00> : vector<8x128xf32>
    %9 = tpu.matmul %7, %8, %cst {dimension_numbers = #tpu.dot_dimension_numbers<[1], [0], [0], [1], [0, 0, 1, 1], [], []>} : vector<8x32xbf16>, vector<32x128xbf16>, vector<8x128xf32> -> vector<8x128xf32>
    %c0_7 = arith.constant 0 : index
    %c0_8 = arith.constant 0 : index
    %10 = vector.load %arg4[%c0_7, %c0_8] : memref<1x128xf32, #tpu.memory_space<vmem>>, vector<1x128xf32>
    %11 = vector.broadcast %10 : vector<1x128xf32> to vector<8x128xf32>
    %12 = arith.addf %9, %11 : vector<8x128xf32>
    %cst_9 = arith.constant 0.000000e+00 : f32
    %13 = vector.broadcast %cst_9 : f32 to vector<8x128xf32>
    %14 = arith.maximumf %12, %13 : vector<8x128xf32>
    %c0_10 = arith.constant 0 : index
    %c0_11 = arith.constant 0 : index
    %15 = vector.load %arg6[%c0_10, %c0_11] : memref<8x128xf32, #tpu.memory_space<vmem>>, vector<8x128xf32>
    tpu.vector_store %arg6[%c0_10, %c0_11], %14 {strides = array<i32>} : memref<8x128xf32, #tpu.memory_space<vmem>>, vector<8x128xf32>,
    return
  }
  func.func @transform_0(%arg0: i32) -> (i32, i32) {
    %c0_i32 = arith.constant 0 : i32
    %c0_i32_0 = arith.constant 0 : i32
    %c0_i32_1 = arith.constant 0 : i32
    return %c0_i32, %c0_i32_0 : i32, i32
  }
  func.func @transform_1(%arg0: i32) -> (i32, i32) {
    %c0_i32 = arith.constant 0 : i32
    %c0_i32_0 = arith.constant 0 : i32
    %c0_i32_1 = arith.constant 0 : i32
    return %c0_i32, %c0_i32_0 : i32, i32
  }
  func.func @transform_2(%arg0: i32) -> (i32, i32) {
    %c0_i32 = arith.constant 0 : i32
    %c0_i32_0 = arith.constant 0 : i32
    %c0_i32_1 = arith.constant 0 : i32
    return %c0_i32, %c0_i32_0 : i32, i32
  }
  func.func @transform_3(%arg0: i32) -> (i32, i32) {
    %c0_i32 = arith.constant 0 : i32
    %c0_i32_0 = arith.constant 0 : i32
    %c0_i32_1 = arith.constant 0 : i32
    return %c0_i32, %c0_i32_0 : i32, i32
  }
  func.func @transform_4(%arg0: i32) -> (i32, i32) {
    %c0_i32 = arith.constant 0 : i32
    %c0_i32_0 = arith.constant 0 : i32
    return %arg0, %c0_i32 : i32, i32
  }
  func.func @transform_5(%arg0: i32) -> (i32, i32) {
    %c0_i32 = arith.constant 0 : i32
    %c0_i32_0 = arith.constant 0 : i32
    return %arg0, %c0_i32 : i32, i32
  }
}

</mosaic_0001>

<bundles_post_ra>
// kernel: tpu_custom_call.1
= control target key start
LH: loop header
LB: loop body
LE: loop exit
PB: predicated region body
PF: predicated region fallthrough
CT: control target
= control target key end

     0   :  { %10 = vsyncpa [#allocation3], 0  ;;  %s353_s0 = inlined_call_operand.hbm [shape: f32[1,32], index: 0, kind: input, shape index: {}]   ;;  %s354_s1 = inlined_call_operand.hbm [shape: f32[1,32], index: 1, kind: input, shape index: {}]   ;;  %s355_s2 = inlined_call_operand.hbm [shape: bf16[32,128], index: 2, kind: input, shape index: {}]   ;;  %s356_s3 = inlined_call_operand.vmem [shape: f32[1,128], index: 3, kind: input, shape index: {}]   ;;  %s357_s4 = inlined_call_operand.hbm [shape: f32[8,32], index: 4, kind: input, shape index: {}]   ;;  %s358_s5 = inlined_call_operand.hbm [shape: f32[8,128], index: 5, kind: output, shape index: {}]  }
   0x1   :  { %11 = vsyncpa [#allocation6], 0 }
   0x2   :  { %12 = vsyncpa [#allocation9], 0  ;;  %s30_s20 = sshll.u32 %s354_s1, 4  ;;  %s31_s20 = int_to_ptr.hbm [resolvable:$true] %s30_s20 }
   0x3   :  { %13 = vsyncpa [#allocation4], 0  ;;  %s298_s21 = smov [#allocation5]   ;;  %s19_s25 = sshll.u32 %s353_s0, 4  ;;  %s20_s25 = int_to_ptr.hbm [resolvable:$true] %s19_s25 }
   0x4   :  { %s32_s22 = sshll.u32 %s298_s21, 4  ;;  %s299_s26 = smov [#allocation2]   ;;  %s33_s22 = int_to_ptr.vmem [resolvable:$true] %s32_s22 }
   0x5   :  { %35 = dma.hbm_to_vmem [thread:$0]  %s31_s20, 16, %s33_s22, [#allocation6]  }
   0x6   :  { %s21_s27 = sshll.u32 %s299_s26, 4  ;;  %s40_s30 = sshll.u32 %s355_s2, 4  ;;  %s22_s27 = int_to_ptr.vmem [resolvable:$true] %s21_s27  ;;  %s41_s30 = int_to_ptr.hbm [resolvable:$true] %s40_s30 }
   0x7   :  { %24 = dma.hbm_to_vmem [thread:$0]  %s20_s25, 16, %s22_s27, [#allocation3]  }
   0x8   :  { %s300_s1 = smov [#allocation7]   ;;  %s56_s9 = sshll.u32 %s357_s4, 4  ;;  %s57_s9 = int_to_ptr.hbm [resolvable:$true] %s56_s9 }
   0x9   :  { %s42_s6 = sshll.u32 %s300_s1, 4  ;;  %s301_s10 = smov 64   ;;  %s43_s6 = int_to_ptr.vmem [resolvable:$true] %s42_s6 }
   0xa   :  { %s302_s0 = smov 4   ;;  %s303_s11 = smov [#allocation8]  }
   0xb   :  { %48 = dma.hbm_to_vmem [thread:$0]  %s41_s30, 256, %s43_s6, [#allocation6], %s301_s10, %s301_s10, %s302_s0  }
   0xc   :  { %s58_s12 = sshll.u32 %s303_s11, 4  ;;  %s59_s12 = int_to_ptr.vmem [resolvable:$true] %s58_s12 }
   0xd   :  { %61 = dma.hbm_to_vmem [thread:$0]  %s57_s9, 128, %s59_s12, [#allocation9]  }
   0xe   :  { %290 = dma.done.wait [#allocation3], 16  }
   0xf   :  { %291 = vsyncadd [#allocation3], 4294967280 }
  0x10   :  { %292 = dma.done.wait [#allocation6], 272  }
  0x11   :  { %293 = vsyncadd [#allocation6], 4294967024 }
  0x12   :  { %294 = dma.done.wait [#allocation9], 128  }
  0x13   :  { %295 = vsyncadd [#allocation9], 4294967168  ;;  %v159_v0 = vld [vmem:[#allocation7 + $0x8] sm:$0xff]  ;;  %v79_v1 = vld [vmem:[#allocation8] sm:$0xff]  ;;  %vm111_vm0 = vcmask 261120   ;;  %s304_s13 = smov [#allocation10]  }
  0x14   :  { %v167_v2 = vld [vmem:[#allocation2] ss:$0 sm:$0xff]  ;;  %121 = vmatpush.bf16.msra.mxu0 %v159_v0  ;;  %v158_v3 = vld [vmem:[#allocation7] sm:$0xff]  ;;  %v168_v4 = vld [vmem:[#allocation5] ss:$0 sm:$0xff]  ;;  %s135_s14 = sshll.u32 %s304_s13, 4  ;;  %s136_s14 = int_to_ptr.vmem [resolvable:$true] %s135_s14 }
  0x15   :  { %v84_v5 = vmul.f32 %v167_v2, %v79_v1  ;;  %v169_v8 = vld [vmem:[%s356_s3] ss:$0 sm:$0xff]  ;;  %s137_s17 = sshll.u32 %s358_s5, 4  ;;  %s138_s17 = int_to_ptr.hbm [resolvable:$true] %s137_s17 }
  0x17   :  { %v89_v6 = vadd.f32 %v168_v4, %v84_v5 }
  0x18   :  { %122 = vmatpush.bf16.msra.mxu0 %v158_v3 }
  0x19   :  { %v90_v7 = vpack.c.bf16 %v89_v6, %v89_v6 }
  0x1b   :  { %157 = vmatmul.msk.bf16.vlgmr.msra.gmra.mxu0 %vm111_vm0, %v90_v7 }
  0x98   :  { %v124_v9 = vpop.f32.mrf.mxu0 }
  0x99   :  { %v125_v10 = vadd.f32 %v169_v8, %v124_v9 }
  0x9b   :  { %v128_v11 = vmax.f32 %v125_v10, 0.0 }
  0x9d   :  { %129 = vst [vmem:[#allocation10] sm:$0xff] %v128_v11 }
  0x9e   :  { %140 = dma.vmem_to_hbm [thread:$0]  %s136_s14, 128, %s138_s17, [#allocation4]  }
  0xa0   :  { %v126_v12 = vpop.f32.mrf.mxu0 }
  0xa1   :  { %296 = dma.done.wait [#allocation4], 128  }
  0xa2   :  { %297 = vsyncadd [#allocation4], 4294967168 }
  0xa3   :  { %145 = vsyncpa [#allocation3], 1 }
  0xa4   :  { %146 = vsyncpa [#allocation6], 1 }
  0xa5   :  { %147 = vsyncpa [#allocation9], 1 }
  0xa6   :  { %148 = vsyncpa [#allocation4], 1 }

</bundles_post_ra>
